<compile_context>
chip_gen: v5e
topology: v5e:2x2
jax: 0.10.0
libtpu: 0.0.40
codegen_flags: <defaults>
</compile_context>

<pallas_src>
import numpy as np
import jax
import jax.numpy as jnp
from jax import lax
from jax.experimental import pallas as pl
from jax.experimental.pallas import tpu as pltpu

_VMEM_LIMIT = 32 * 1024 * 1024


def _bf16_round(x):
    return x.astype(jnp.bfloat16).astype(jnp.float32)


def _batch_tile(n, cap=8):
    nb = min(n, cap)
    while n % nb:
        nb -= 1
    return nb


# ---------------------------------------------------------------------------
# Fused kernel: 3x3 conv (banded matmuls) + BN2 + flatten + Linear + BN1
# ---------------------------------------------------------------------------
def head_kernel(x_ref, cw_ref, cshift_ref, fw_ref, oshift_ref, o_ref):
    # x_ref:      (NB, H, W*Cin)       bf16  NHWC rows, channels innermost on lanes
    # cw_ref:     (3, W*Cin, Wo*Cout)  bf16  banded conv weight, bn2_scale folded in
    # cshift_ref: (1, Wo*Cout)         f32   bn2 shift, tiled per (wo, c) lane
    # fw_ref:     (Ho, Wo*Cout, E)     bf16  FC weight, bn1_scale folded in
    # oshift_ref: (1, E)               f32   bn1_scale * fc_bias + bn1_shift
    # o_ref:      (NB, E)              f32
    nb = x_ref.shape[0]
    wcin = x_ref.shape[2]
    ho, wocout, _ = fw_ref.shape

    x = x_ref[...]                                       # (NB, H, W*Cin) bf16

    # Conv: one banded MXU matmul per kernel row dy, accumulated in f32.
    acc = None
    for dy in range(3):
        rows = x[:, dy:dy + ho, :].reshape(nb * ho, wcin)            # (NB*Ho, W*Cin)
        part = jnp.dot(rows, cw_ref[dy], preferred_element_type=jnp.float32)
        acc = part if acc is None else acc + part                    # (NB*Ho, Wo*Cout)

    # BN2 shift, intermediate held as bf16 (Dropout2d is identity in eval).
    y = (acc + cshift_ref[...]).astype(jnp.bfloat16).reshape(nb, ho, wocout)

    # Linear + BN1: accumulate Ho lane-dense matmuls (flatten order baked into fw).
    out = None
    for r in range(ho):
        part = jnp.dot(y[:, r, :], fw_ref[r], preferred_element_type=jnp.float32)
        out = part if out is None else out + part                    # (NB, E)

    o_ref[...] = out + oshift_ref[...]


@jax.jit
def backbone_head_forward(x_nchw, params):
    n, cin, h, w = x_nchw.shape
    cw = params["conv_w"]            # (3, W*Cin, Wo*Cout) bf16
    cshift = params["bn2_shift"]     # (1, Wo*Cout)        f32
    fw = params["fc_w"]              # (Ho, Wo*Cout, E)    bf16
    oshift = params["out_shift"]     # (1, E)              f32
    ho, wocout, emb = fw.shape
    wcin = w * cin

    # Layout glue (XLA): NCHW -> NHWC with (W, Cin) flattened onto the lane axis, bf16.
    x2 = jnp.transpose(x_nchw, (0, 2, 3, 1)).reshape(n, h, wcin).astype(jnp.bfloat16)

    nb = _batch_tile(n)
    return pl.pallas_call(
        head_kernel,
        out_shape=jax.ShapeDtypeStruct((n, emb), jnp.float32),
        grid_spec=pltpu.PrefetchScalarGridSpec(
            num_scalar_prefetch=0,
            grid=(n // nb,),
            in_specs=[
                pl.BlockSpec((nb, h, wcin), lambda b: (b, 0, 0)),
                pl.BlockSpec((3, wcin, wocout), lambda b: (0, 0, 0)),
                pl.BlockSpec((1, wocout), lambda b: (0, 0)),
                pl.BlockSpec((ho, wocout, emb), lambda b: (0, 0, 0)),
                pl.BlockSpec((1, emb), lambda b: (0, 0)),
            ],
            out_specs=pl.BlockSpec((nb, emb), lambda b: (b, 0)),
        ),
        compiler_params=pltpu.CompilerParams(
            dimension_semantics=("parallel",),
            vmem_limit_bytes=_VMEM_LIMIT),
    )(x2, cw, cshift, fw, oshift)


# ---------------------------------------------------------------------------
# Parameter preparation (offline folding / permutation / banded packing / bf16)
# ---------------------------------------------------------------------------
def fold_bn(gamma, beta, mean, var, eps):
    scale = gamma / jnp.sqrt(var + eps)
    shift = beta - mean * scale
    return scale, shift


def make_params(key, cin, cout, h, w, emb):
    ho, wo = h - 2, w - 2
    keys = jax.random.split(key, 12)

    # torch-layout originals, rounded to bf16-representable values so the f32 reference
    # and the bf16 kernel start from identical weight values.
    conv_w_oihw = _bf16_round(
        jax.random.normal(keys[0], (cout, cin, 3, 3), jnp.float32) * 0.1)
    fc_w_ef = _bf16_round(
        jax.random.normal(keys[5], (emb, cout * ho * wo), jnp.float32) * 0.05)
    fc_b = 0.05 * jax.random.normal(keys[6], (emb,), jnp.float32)

    bn2_gamma = 1.0 + 0.1 * jax.random.normal(keys[1], (cout,), jnp.float32)
    bn2_beta = 0.1 * jax.random.normal(keys[2], (cout,), jnp.float32)
    bn2_mean = 0.1 * jax.random.normal(keys[3], (cout,), jnp.float32)
    bn2_var = jnp.abs(1.0 + 0.1 * jax.random.normal(keys[4], (cout,), jnp.float32))
    bn2_scale, bn2_shift = fold_bn(bn2_gamma, bn2_beta, bn2_mean, bn2_var, 2e-5)

    bn1_gamma = 1.0 + 0.1 * jax.random.normal(keys[7], (emb,), jnp.float32)
    bn1_beta = 0.1 * jax.random.normal(keys[8], (emb,), jnp.float32)
    bn1_mean = 0.1 * jax.random.normal(keys[9], (emb,), jnp.float32)
    bn1_var = jnp.abs(1.0 + 0.1 * jax.random.normal(keys[10], (emb,), jnp.float32))
    bn1_scale, bn1_shift = fold_bn(bn1_gamma, bn1_beta, bn1_mean, bn1_var, 1e-5)

    # Banded conv weight (3, W*Cin, Wo*Cout), bn2_scale folded into output columns:
    #   A[dy, (wo_+dx)*Cin + ci, wo_*Cout + c] = conv_w[c, ci, dy, dx] * bn2_scale[c]
    wnp = np.asarray(conv_w_oihw, np.float32)
    s2 = np.asarray(bn2_scale, np.float32)
    A = np.zeros((3, w * cin, wo * cout), np.float32)
    for dy in range(3):
        for dx in range(3):
            blk = wnp[:, :, dy, dx].T * s2[None, :]          # (Cin, Cout)
            for wo_ in range(wo):
                wi = wo_ + dx
                A[dy, wi * cin:(wi + 1) * cin, wo_ * cout:(wo_ + 1) * cout] = blk
    conv_w = jnp.asarray(A).astype(jnp.bfloat16)

    # bn2 shift, tiled to the (wo, c) lane order of the packed conv output.
    bn2_shift_p = jnp.asarray(
        np.tile(np.asarray(bn2_shift, np.float32), wo).reshape(1, wo * cout))

    # FC weight: torch rows flatten (C, Ho, Wo); the kernel consumes (ho, (wo, c)) with
    # (wo, c) on the lane axis, so permute once here and fold in bn1_scale.
    Wnp = np.asarray(fc_w_ef, np.float32).reshape(emb, cout, ho, wo)
    W3 = (np.transpose(Wnp, (2, 3, 1, 0))
          * np.asarray(bn1_scale, np.float32)[None, None, None, :])
    fc_w = jnp.asarray(W3.reshape(ho, wo * cout, emb)).astype(jnp.bfloat16)

    # fc bias folded into the bn1 shift:  (y@W + b)*s1 + t1 == y@(W*s1) + (s1*b + t1)
    out_shift = jnp.asarray(
        (np.asarray(bn1_scale, np.float32) * np.asarray(fc_b, np.float32)
         + np.asarray(bn1_shift, np.float32)).reshape(1, emb))

    params = {"conv_w": conv_w, "bn2_shift": bn2_shift_p,
              "fc_w": fc_w, "out_shift": out_shift}
    ref = {"conv_w_oihw": conv_w_oihw, "fc_w_ef": fc_w_ef, "fc_b": fc_b,
           "bn2_scale": bn2_scale, "bn2_shift": bn2_shift,
           "bn1_scale": bn1_scale, "bn1_shift": bn1_shift}
    return params, ref


def reference_forward(x_nchw, ref):
    """Pure-JAX reference with the original module's eval semantics
    (conv -> BN2 -> Dropout2d(identity) -> flatten -> Linear -> BN1), mirroring the
    kernel's bf16 quantization of the input and of the intermediate."""
    xr = _bf16_round(x_nchw)
    y = lax.conv_general_dilated(
        xr, ref["conv_w_oihw"], window_strides=(1, 1), padding="VALID",
        dimension_numbers=("NCHW", "OIHW", "NCHW"))
    y = y * ref["bn2_scale"][None, :, None, None] + ref["bn2_shift"][None, :, None, None]
    y = _bf16_round(y)                           # intermediate held as bf16 in the kernel
    y = y.reshape(y.shape[0], -1)                # torch (C, H, W) flatten order
    y = y @ ref["fc_w_ef"].T + ref["fc_b"]
    return y * ref["bn1_scale"] + ref["bn1_shift"]


if __name__ == "__main__":
    # Backbone feature map (N, C, H, W) = (2, 8, 10, 10), out_conv = 16, embedding = 32.
    N, Cin, H, W = 2, 8, 10, 10
    Cout, EMB = 16, 32

    key = jax.random.PRNGKey(0)
    kx, kp = jax.random.split(key)
    x = jax.random.normal(kx, (N, Cin, H, W), jnp.float32)
    params, ref_params = make_params(kp, Cin, Cout, H, W, EMB)

    out = backbone_head_forward(x, params)
    out = jax.block_until_ready(out)

    ref = reference_forward(x, ref_params)
    assert out.shape == (N, EMB)
    # bf16 weights/activations with BN scales folded into the bf16 weights -> the kernel
    # and the unfolded-f32 reference legitimately differ at the ~1e-2 level.
    assert jnp.allclose(out, ref, rtol=4e-2, atol=4e-2), "mismatch vs reference"

    print("KERNEL_OK")
</pallas_src>

<mosaic_0001>
module attributes {stable_mosaic.version = 11 : i64} {
  func.func @head_kernel(%arg0: i32, %arg1: memref<2x10x80xbf16, #tpu.memory_space<vmem>>, %arg2: memref<3x80x128xbf16, #tpu.memory_space<vmem>>, %arg3: memref<1x128xf32, #tpu.memory_space<vmem>>, %arg4: memref<8x128x32xbf16, #tpu.memory_space<vmem>>, %arg5: memref<1x32xf32, #tpu.memory_space<vmem>>, %arg6: memref<2x32xf32, #tpu.memory_space<vmem>>) attributes {dimension_semantics = [#tpu.dimension_semantics<parallel>], iteration_bounds = array<i64: 1>, scalar_prefetch = 0 : i64, scratch_operands = 0 : i64, tpu.core_type = #tpu.core_type<tc>, window_params = [{transform_indices = @transform_0, window_bounds = array<i64: 2, 10, 80>}, {pipeline_mode = #tpu.pipeline_mode<synchronous>, transform_indices = @transform_1, window_bounds = array<i64: 3, 80, 128>}, {pipeline_mode = #tpu.pipeline_mode<synchronous>, transform_indices = @transform_2, window_bounds = array<i64: 1, 128>}, {pipeline_mode = #tpu.pipeline_mode<synchronous>, transform_indices = @transform_3, window_bounds = array<i64: 8, 128, 32>}, {pipeline_mode = #tpu.pipeline_mode<synchronous>, transform_indices = @transform_4, window_bounds = array<i64: 1, 32>}, {transform_indices = @transform_5, window_bounds = array<i64: 2, 32>}]} {
    %c0 = arith.constant 0 : index
    %c0_0 = arith.constant 0 : index
    %c0_1 = arith.constant 0 : index
    %0 = vector.load %arg1[%c0, %c0_0, %c0_1] : memref<2x10x80xbf16, #tpu.memory_space<vmem>>, vector<2x10x80xbf16>
    %1 = vector.extract_strided_slice %0 {offsets = [0, 0, 0], sizes = [2, 8, 80], strides = [1, 1, 1]} : vector<2x10x80xbf16> to vector<2x8x80xbf16>
    %2 = vector.shape_cast %1 : vector<2x8x80xbf16> to vector<16x80xbf16>
    %c0_2 = arith.constant 0 : index
    %c0_3 = arith.constant 0 : index
    %c0_4 = arith.constant 0 : index
    %3 = vector.load %arg2[%c0_2, %c0_3, %c0_4] : memref<3x80x128xbf16, #tpu.memory_space<vmem>>, vector<1x80x128xbf16>
    %4 = vector.shape_cast %3 : vector<1x80x128xbf16> to vector<80x128xbf16>
    %cst = arith.constant dense<0.000000e+00> : vector<16x128xf32>
    %5 = tpu.matmul %2, %4, %cst {dimension_numbers = #tpu.dot_dimension_numbers<[1], [0], [0], [1], [0, 0, 1, 1], [], []>} : vector<16x80xbf16>, vector<80x128xbf16>, vector<16x128xf32> -> vector<16x128xf32>
    %6 = vector.extract_strided_slice %0 {offsets = [0, 1, 0], sizes = [2, 8, 80], strides = [1, 1, 1]} : vector<2x10x80xbf16> to vector<2x8x80xbf16>
    %7 = vector.shape_cast %6 : vector<2x8x80xbf16> to vector<16x80xbf16>
    %c1 = arith.constant 1 : index
    %c0_5 = arith.constant 0 : index
    %c0_6 = arith.constant 0 : index
    %8 = vector.load %arg2[%c1, %c0_5, %c0_6] : memref<3x80x128xbf16, #tpu.memory_space<vmem>>, vector<1x80x128xbf16>
    %9 = vector.shape_cast %8 : vector<1x80x128xbf16> to vector<80x128xbf16>
    %cst_7 = arith.constant dense<0.000000e+00> : vector<16x128xf32>
    %10 = tpu.matmul %7, %9, %cst_7 {dimension_numbers = #tpu.dot_dimension_numbers<[1], [0], [0], [1], [0, 0, 1, 1], [], []>} : vector<16x80xbf16>, vector<80x128xbf16>, vector<16x128xf32> -> vector<16x128xf32>
    %11 = arith.addf %5, %10 : vector<16x128xf32>
    %12 = vector.extract_strided_slice %0 {offsets = [0, 2, 0], sizes = [2, 8, 80], strides = [1, 1, 1]} : vector<2x10x80xbf16> to vector<2x8x80xbf16>
    %13 = vector.shape_cast %12 : vector<2x8x80xbf16> to vector<16x80xbf16>
    %c2 = arith.constant 2 : index
    %c0_8 = arith.constant 0 : index
    %c0_9 = arith.constant 0 : index
    %14 = vector.load %arg2[%c2, %c0_8, %c0_9] : memref<3x80x128xbf16, #tpu.memory_space<vmem>>, vector<1x80x128xbf16>
    %15 = vector.shape_cast %14 : vector<1x80x128xbf16> to vector<80x128xbf16>
    %cst_10 = arith.constant dense<0.000000e+00> : vector<16x128xf32>
    %16 = tpu.matmul %13, %15, %cst_10 {dimension_numbers = #tpu.dot_dimension_numbers<[1], [0], [0], [1], [0, 0, 1, 1], [], []>} : vector<16x80xbf16>, vector<80x128xbf16>, vector<16x128xf32> -> vector<16x128xf32>
    %17 = arith.addf %11, %16 : vector<16x128xf32>
    %c0_11 = arith.constant 0 : index
    %c0_12 = arith.constant 0 : index
    %18 = vector.load %arg3[%c0_11, %c0_12] : memref<1x128xf32, #tpu.memory_space<vmem>>, vector<1x128xf32>
    %19 = vector.broadcast %18 : vector<1x128xf32> to vector<16x128xf32>
    %20 = arith.addf %17, %19 : vector<16x128xf32>
    %21 = arith.truncf %20 : vector<16x128xf32> to vector<16x128xbf16>
    %22 = vector.shape_cast %21 : vector<16x128xbf16> to vector<2x8x128xbf16>
    %23 = vector.extract_strided_slice %22 {offsets = [0, 0, 0], sizes = [2, 1, 128], strides = [1, 1, 1]} : vector<2x8x128xbf16> to vector<2x1x128xbf16>
    %24 = vector.shape_cast %23 : vector<2x1x128xbf16> to vector<2x128xbf16>
    %c0_13 = arith.constant 0 : index
    %c0_14 = arith.constant 0 : index
    %c0_15 = arith.constant 0 : index
    %25 = vector.load %arg4[%c0_13, %c0_14, %c0_15] : memref<8x128x32xbf16, #tpu.memory_space<vmem>>, vector<1x128x32xbf16>
    %26 = vector.shape_cast %25 : vector<1x128x32xbf16> to vector<128x32xbf16>
    %cst_16 = arith.constant dense<0.000000e+00> : vector<2x32xf32>
    %27 = tpu.matmul %24, %26, %cst_16 {dimension_numbers = #tpu.dot_dimension_numbers<[1], [0], [0], [1], [0, 0, 1, 1], [], []>} : vector<2x128xbf16>, vector<128x32xbf16>, vector<2x32xf32> -> vector<2x32xf32>
    %28 = vector.extract_strided_slice %22 {offsets = [0, 1, 0], sizes = [2, 1, 128], strides = [1, 1, 1]} : vector<2x8x128xbf16> to vector<2x1x128xbf16>
    %29 = vector.shape_cast %28 : vector<2x1x128xbf16> to vector<2x128xbf16>
    %c1_17 = arith.constant 1 : index
    %c0_18 = arith.constant 0 : index
    %c0_19 = arith.constant 0 : index
    %30 = vector.load %arg4[%c1_17, %c0_18, %c0_19] : memref<8x128x32xbf16, #tpu.memory_space<vmem>>, vector<1x128x32xbf16>
    %31 = vector.shape_cast %30 : vector<1x128x32xbf16> to vector<128x32xbf16>
    %cst_20 = arith.constant dense<0.000000e+00> : vector<2x32xf32>
    %32 = tpu.matmul %29, %31, %cst_20 {dimension_numbers = #tpu.dot_dimension_numbers<[1], [0], [0], [1], [0, 0, 1, 1], [], []>} : vector<2x128xbf16>, vector<128x32xbf16>, vector<2x32xf32> -> vector<2x32xf32>
    %33 = arith.addf %27, %32 : vector<2x32xf32>
    %34 = vector.extract_strided_slice %22 {offsets = [0, 2, 0], sizes = [2, 1, 128], strides = [1, 1, 1]} : vector<2x8x128xbf16> to vector<2x1x128xbf16>
    %35 = vector.shape_cast %34 : vector<2x1x128xbf16> to vector<2x128xbf16>
    %c2_21 = arith.constant 2 : index
    %c0_22 = arith.constant 0 : index
    %c0_23 = arith.constant 0 : index
    %36 = vector.load %arg4[%c2_21, %c0_22, %c0_23] : memref<8x128x32xbf16, #tpu.memory_space<vmem>>, vector<1x128x32xbf16>
    %37 = vector.shape_cast %36 : vector<1x128x32xbf16> to vector<128x32xbf16>
    %cst_24 = arith.constant dense<0.000000e+00> : vector<2x32xf32>
    %38 = tpu.matmul %35, %37, %cst_24 {dimension_numbers = #tpu.dot_dimension_numbers<[1], [0], [0], [1], [0, 0, 1, 1], [], []>} : vector<2x128xbf16>, vector<128x32xbf16>, vector<2x32xf32> -> vector<2x32xf32>
    %39 = arith.addf %33, %38 : vector<2x32xf32>
    %40 = vector.extract_strided_slice %22 {offsets = [0, 3, 0], sizes = [2, 1, 128], strides = [1, 1, 1]} : vector<2x8x128xbf16> to vector<2x1x128xbf16>
    %41 = vector.shape_cast %40 : vector<2x1x128xbf16> to vector<2x128xbf16>
    %c3 = arith.constant 3 : index
    %c0_25 = arith.constant 0 : index
    %c0_26 = arith.constant 0 : index
    %42 = vector.load %arg4[%c3, %c0_25, %c0_26] : memref<8x128x32xbf16, #tpu.memory_space<vmem>>, vector<1x128x32xbf16>
    %43 = vector.shape_cast %42 : vector<1x128x32xbf16> to vector<128x32xbf16>
    %cst_27 = arith.constant dense<0.000000e+00> : vector<2x32xf32>
    %44 = tpu.matmul %41, %43, %cst_27 {dimension_numbers = #tpu.dot_dimension_numbers<[1], [0], [0], [1], [0, 0, 1, 1], [], []>} : vector<2x128xbf16>, vector<128x32xbf16>, vector<2x32xf32> -> vector<2x32xf32>
    %45 = arith.addf %39, %44 : vector<2x32xf32>
    %46 = vector.extract_strided_slice %22 {offsets = [0, 4, 0], sizes = [2, 1, 128], strides = [1, 1, 1]} : vector<2x8x128xbf16> to vector<2x1x128xbf16>
    %47 = vector.shape_cast %46 : vector<2x1x128xbf16> to vector<2x128xbf16>
    %c4 = arith.constant 4 : index
    %c0_28 = arith.constant 0 : index
    %c0_29 = arith.constant 0 : index
    %48 = vector.load %arg4[%c4, %c0_28, %c0_29] : memref<8x128x32xbf16, #tpu.memory_space<vmem>>, vector<1x128x32xbf16>
    %49 = vector.shape_cast %48 : vector<1x128x32xbf16> to vector<128x32xbf16>
    %cst_30 = arith.constant dense<0.000000e+00> : vector<2x32xf32>
    %50 = tpu.matmul %47, %49, %cst_30 {dimension_numbers = #tpu.dot_dimension_numbers<[1], [0], [0], [1], [0, 0, 1, 1], [], []>} : vector<2x128xbf16>, vector<128x32xbf16>, vector<2x32xf32> -> vector<2x32xf32>
    %51 = arith.addf %45, %50 : vector<2x32xf32>
    %52 = vector.extract_strided_slice %22 {offsets = [0, 5, 0], sizes = [2, 1, 128], strides = [1, 1, 1]} : vector<2x8x128xbf16> to vector<2x1x128xbf16>
    %53 = vector.shape_cast %52 : vector<2x1x128xbf16> to vector<2x128xbf16>
    %c5 = arith.constant 5 : index
    %c0_31 = arith.constant 0 : index
    %c0_32 = arith.constant 0 : index
    %54 = vector.load %arg4[%c5, %c0_31, %c0_32] : memref<8x128x32xbf16, #tpu.memory_space<vmem>>, vector<1x128x32xbf16>
    %55 = vector.shape_cast %54 : vector<1x128x32xbf16> to vector<128x32xbf16>
    %cst_33 = arith.constant dense<0.000000e+00> : vector<2x32xf32>
    %56 = tpu.matmul %53, %55, %cst_33 {dimension_numbers = #tpu.dot_dimension_numbers<[1], [0], [0], [1], [0, 0, 1, 1], [], []>} : vector<2x128xbf16>, vector<128x32xbf16>, vector<2x32xf32> -> vector<2x32xf32>
    %57 = arith.addf %51, %56 : vector<2x32xf32>
    %58 = vector.extract_strided_slice %22 {offsets = [0, 6, 0], sizes = [2, 1, 128], strides = [1, 1, 1]} : vector<2x8x128xbf16> to vector<2x1x128xbf16>
    %59 = vector.shape_cast %58 : vector<2x1x128xbf16> to vector<2x128xbf16>
    %c6 = arith.constant 6 : index
    %c0_34 = arith.constant 0 : index
    %c0_35 = arith.constant 0 : index
    %60 = vector.load %arg4[%c6, %c0_34, %c0_35] : memref<8x128x32xbf16, #tpu.memory_space<vmem>>, vector<1x128x32xbf16>
    %61 = vector.shape_cast %60 : vector<1x128x32xbf16> to vector<128x32xbf16>
    %cst_36 = arith.constant dense<0.000000e+00> : vector<2x32xf32>
    %62 = tpu.matmul %59, %61, %cst_36 {dimension_numbers = #tpu.dot_dimension_numbers<[1], [0], [0], [1], [0, 0, 1, 1], [], []>} : vector<2x128xbf16>, vector<128x32xbf16>, vector<2x32xf32> -> vector<2x32xf32>
    %63 = arith.addf %57, %62 : vector<2x32xf32>
    %64 = vector.extract_strided_slice %22 {offsets = [0, 7, 0], sizes = [2, 1, 128], strides = [1, 1, 1]} : vector<2x8x128xbf16> to vector<2x1x128xbf16>
    %65 = vector.shape_cast %64 : vector<2x1x128xbf16> to vector<2x128xbf16>
    %c7 = arith.constant 7 : index
    %c0_37 = arith.constant 0 : index
    %c0_38 = arith.constant 0 : index
    %66 = vector.load %arg4[%c7, %c0_37, %c0_38] : memref<8x128x32xbf16, #tpu.memory_space<vmem>>, vector<1x128x32xbf16>
    %67 = vector.shape_cast %66 : vector<1x128x32xbf16> to vector<128x32xbf16>
    %cst_39 = arith.constant dense<0.000000e+00> : vector<2x32xf32>
    %68 = tpu.matmul %65, %67, %cst_39 {dimension_numbers = #tpu.dot_dimension_numbers<[1], [0], [0], [1], [0, 0, 1, 1], [], []>} : vector<2x128xbf16>, vector<128x32xbf16>, vector<2x32xf32> -> vector<2x32xf32>
    %69 = arith.addf %63, %68 : vector<2x32xf32>
    %c0_40 = arith.constant 0 : index
    %c0_41 = arith.constant 0 : index
    %70 = vector.load %arg5[%c0_40, %c0_41] : memref<1x32xf32, #tpu.memory_space<vmem>>, vector<1x32xf32>
    %71 = vector.broadcast %70 : vector<1x32xf32> to vector<2x32xf32>
    %72 = arith.addf %69, %71 : vector<2x32xf32>
    %c0_42 = arith.constant 0 : index
    %c0_43 = arith.constant 0 : index
    %73 = vector.load %arg6[%c0_42, %c0_43] : memref<2x32xf32, #tpu.memory_space<vmem>>, vector<2x32xf32>
    tpu.vector_store %arg6[%c0_42, %c0_43], %72 {strides = array<i32>} : memref<2x32xf32, #tpu.memory_space<vmem>>, vector<2x32xf32>,
    return
  }
  func.func @transform_0(%arg0: i32) -> (i32, i32, i32) {
    %c0_i32 = arith.constant 0 : i32
    %c0_i32_0 = arith.constant 0 : i32
    %c0_i32_1 = arith.constant 0 : i32
    return %arg0, %c0_i32, %c0_i32_0 : i32, i32, i32
  }
  func.func @transform_1(%arg0: i32) -> (i32, i32, i32) {
    %c0_i32 = arith.constant 0 : i32
    %c0_i32_0 = arith.constant 0 : i32
    %c0_i32_1 = arith.constant 0 : i32
    %c0_i32_2 = arith.constant 0 : i32
    return %c0_i32, %c0_i32_0, %c0_i32_1 : i32, i32, i32
  }
  func.func @transform_2(%arg0: i32) -> (i32, i32) {
    %c0_i32 = arith.constant 0 : i32
    %c0_i32_0 = arith.constant 0 : i32
    %c0_i32_1 = arith.constant 0 : i32
    return %c0_i32, %c0_i32_0 : i32, i32
  }
  func.func @transform_3(%arg0: i32) -> (i32, i32, i32) {
    %c0_i32 = arith.constant 0 : i32
    %c0_i32_0 = arith.constant 0 : i32
    %c0_i32_1 = arith.constant 0 : i32
    %c0_i32_2 = arith.constant 0 : i32
    return %c0_i32, %c0_i32_0, %c0_i32_1 : i32, i32, i32
  }
  func.func @transform_4(%arg0: i32) -> (i32, i32) {
    %c0_i32 = arith.constant 0 : i32
    %c0_i32_0 = arith.constant 0 : i32
    %c0_i32_1 = arith.constant 0 : i32
    return %c0_i32, %c0_i32_0 : i32, i32
  }
  func.func @transform_5(%arg0: i32) -> (i32, i32) {
    %c0_i32 = arith.constant 0 : i32
    %c0_i32_0 = arith.constant 0 : i32
    return %arg0, %c0_i32 : i32, i32
  }
}

</mosaic_0001>

<bundles_post_ra>
// kernel: backbone_head_forward.1
= control target key start
LH: loop header
LB: loop body
LE: loop exit
PB: predicated region body
PF: predicated region fallthrough
CT: control target
= control target key end

     0   :  { %vm183_vm0 = vcmask 1042432   ;;  %vm184_vm1 = vcmask 1046532   ;;  %vm36_vm2 = vsmask.f32 3328  ;;  %vm37_vm3 = vsmask.f32 7440  ;;  %s1855_s0 = inlined_call_operand.vmem [shape: bf16[2,10,80], index: 0, kind: input, shape index: {}]   ;;  %s1856_s1 = inlined_call_operand.vmem [shape: bf16[3,80,128], index: 1, kind: input, shape index: {}]   ;;  %s1857_s2 = inlined_call_operand.vmem [shape: f32[1,128], index: 2, kind: input, shape index: {}]   ;;  %s1858_s3 = inlined_call_operand.vmem [shape: bf16[8,128,32], index: 3, kind: input, shape index: {}]   ;;  %s1859_s4 = inlined_call_operand.vmem [shape: f32[1,32], index: 4, kind: input, shape index: {}]   ;;  %s1860_s5 = inlined_call_operand.hbm [shape: f32[2,32], index: 5, kind: output, shape index: {}]  }
   0x1   :  { %v1433_v0 = vld [vmem:[%s1856_s1 + $0x48] sm:$0xff]  ;;  %v1428_v1 = vld [vmem:[%s1856_s1 + $0x20] sm:$0xff]  ;;  %v1438_v2 = vld [vmem:[%s1856_s1 + $0x70] sm:$0xff] }
   0x2   :  { %118 = vmatpush.bf16.msra.mxu0 %v1433_v0  ;;  %170 = vmatpush.bf16.msra.mxu1 %v1428_v1  ;;  %v1432_v3 = vld [vmem:[%s1856_s1 + $0x40] sm:$0xff]  ;;  %v1427_v4 = vld [vmem:[%s1856_s1 + $0x18] sm:$0xff]  ;;  %v1437_v5 = vld [vmem:[%s1856_s1 + $0x68] sm:$0xff] }
   0x3   :  { %244 = vmatpush.bf16.msra.mxu2 %v1438_v2  ;;  %v1431_v6 = vld [vmem:[%s1856_s1 + $0x38] sm:$0xff]  ;;  %v1426_v7 = vld [vmem:[%s1856_s1 + $0x10] sm:$0xff]  ;;  %v22_v8 = vld [vmem:[%s1855_s0] sm:$0xf] }
   0x4   :  { %v23_v9 = vld [vmem:[%s1855_s0 + $0x4] sm:$0x1]  ;;  %v24_v10 = vld [vmem:[%s1855_s0 + $0x8] sm:$0xf]  ;;  %v25_v11 = vld [vmem:[%s1855_s0 + $0xc] sm:$0x1] }
   0x5   :  { %v40_v12 = vshrl.u32 %v22_v8, 16  ;;  %v43_v13 = vshll.u32 %v22_v8, 16  ;;  %v49_v14 = vshll.u32 %v23_v9, 16  ;;  %v54_v15 = vshrl.u32 %v24_v10, 16  ;;  %v1436_v16 = vld [vmem:[%s1856_s1 + $0x60] sm:$0xff]  ;;  %v1454_v22 = vld [vmem:[%s1858_s3 + $0x78] sm:$0xff]  ;;  %vm1607_vm4 = vmor %vm183_vm0, %vm184_vm1 }
   0x6   :  { %119 = vmatpush.bf16.msra.mxu0 %v1432_v3  ;;  %171 = vmatpush.bf16.msra.mxu1 %v1427_v4  ;;  %v57_v17 = vshll.u32 %v24_v10, 16  ;;  %v63_v18 = vshll.u32 %v25_v11, 16  ;;  %v1020_v26 = vrot.slane %v22_v8, 9  ;;  %v1430_v27 = vld [vmem:[%s1856_s1 + $0x30] sm:$0xff]  ;;  %v1425_v28 = vld [vmem:[%s1856_s1 + $0x8] sm:$0xff]  ;;  %v188_v30 = vrot.slane %v23_v9, 5  ;;  %vm1622_vm5 = vmor %vm36_vm2, %vm37_vm3 }
   0x7   :  { %245 = vmatpush.bf16.msra.mxu2 %v1437_v5  ;;  %v42_v19 = vrot.slane %v40_v12, 4  ;;  %v45_v20 = vrot.slane %v43_v13, 5  ;;  %v56_v21 = vrot.slane %v54_v15, 4  ;;  %v51_v23 = vrot.slane %v49_v14, 5  ;;  %v1435_v33 = vld [vmem:[%s1856_s1 + $0x58] sm:$0xff]  ;;  %359 = vmatpush.bf16.msra.mxu3 %v1454_v22  ;;  %v1453_v37 = vld [vmem:[%s1858_s3 + $0x70] sm:$0xff] }
   0x8   :  { %v59_v24 = vrot.slane %v57_v17, 5  ;;  %v1021_v31 = vrot.slane %v24_v10, 9  ;;  %v192_v32 = vrot.slane %v25_v11, 5  ;;  %v65_v36 = vrot.slane %v63_v18, 5  ;;  %v1429_v38 = vld [vmem:[%s1856_s1 + $0x28] sm:$0xff]  ;;  %v1424_v42 = vld [vmem:[%s1856_s1] sm:$0xff] }
   0x9   :  { %v46_v29 = vor.u32 %v45_v20, %v42_v19  ;;  %v189_v40 = vsel %vm1607_vm4, %v1020_v26, %v188_v30  ;;  %v997_v44 = vld [vmem:[%s1855_s0] sm:$0xf]  ;;  %v1423_v46 = vld [vmem:[%s1855_s0 + $0x4] sm:$0xf0] }
   0xa   :  { %120 = vmatpush.bf16.msra.mxu0 %v1431_v6  ;;  %172 = vmatpush.bf16.msra.mxu1 %v1426_v7  ;;  %v60_v35 = vor.u32 %v59_v24, %v56_v21  ;;  %v193_v41 = vsel %vm1607_vm4, %v1021_v31, %v192_v32  ;;  %v205_v47 = vunpack.c.l.b16 %v189_v40 }
   0xb   :  { %246 = vmatpush.bf16.msra.mxu2 %v1436_v16  ;;  %v47_v39 = vrot.slane %v46_v29, 4  ;;  %v206_v48 = vunpack.c.l.b16 %v193_v41 }
   0xc   :  { %v61_v43 = vrot.slane %v60_v35, 4 }
   0xd   :  { %v52_v45 = vsel %vm1622_vm5, %v47_v39, %v51_v23 }
   0xe   :  { %121 = vmatpush.bf16.msra.mxu0 %v1430_v27  ;;  %173 = vmatpush.bf16.msra.mxu1 %v1425_v28 }
   0xf   :  { %10 = vsyncpa [#allocation3], 0  ;;  %247 = vmatpush.bf16.msra.mxu2 %v1435_v33  ;;  %v1434_v49 = vld [vmem:[%s1856_s1 + $0x50] sm:$0xff]  ;;  %v66_v50 = vsel %vm1622_vm5, %v61_v43, %v65_v36  ;;  %v78_v51 = vunpack.c.l.b16 %v52_v45  ;;  %v1446_v52 = vld [vmem:[%s1858_s3 + $0x38] sm:$0xff]  ;;  %360 = vmatpush.bf16.msra.mxu3 %v1453_v37  ;;  %v998_v56 = vor.u32 %v1423_v46, %v997_v44  ;;  %vm111_vm6 = vcmask 654336   ;;  %s1532_s30 = smov [#allocation2]  }
  0x10   :  { %v79_v53 = vunpack.c.l.b16 %v66_v50  ;;  %v1462_v54 = vld [vmem:[%s1858_s3 + $0xb8] sm:$0xff]  ;;  %v207_v58 = vpack.c.b16 %v206_v48, %v205_v47  ;;  %v1452_v59 = vld [vmem:[%s1858_s3 + $0x68] sm:$0xff]  ;;  %v1445_v60 = vld [vmem:[%s1858_s3 + $0x30] sm:$0xff]  ;;  %vm307_vm7 = vcmask 1041409   ;;  %s953_s6 = sshll.u32 %s1532_s30, 4  ;;  %s955_s9 = sshll.u32 %s1860_s5, 4  ;;  %s954_s6 = int_to_ptr.vmem [resolvable:$true] %s953_s6  ;;  %s956_s9 = int_to_ptr.hbm [resolvable:$true] %s955_s9 }
  0x11   :  { %v1470_v55 = vld [vmem:[%s1858_s3 + $0xf8] sm:$0xff]  ;;  %v1461_v61 = vld [vmem:[%s1858_s3 + $0xb0] sm:$0xff]  ;;  %v1451_v63 = vld [vmem:[%s1858_s3 + $0x60] sm:$0xff]  ;;  %vm946_vm8 = vcmask 254976  }
  0x12   :  { %122 = vmatpush.bf16.msra.mxu0 %v1429_v38  ;;  %174 = vmatpush.bf16.msra.mxu1 %v1424_v42  ;;  %v80_v57 = vpack.c.b16 %v79_v53, %v78_v51  ;;  %v1469_v62 = vld [vmem:[%s1858_s3 + $0xf0] sm:$0xff]  ;;  %v1444_v0 = vld [vmem:[%s1858_s3 + $0x28] sm:$0xff]  ;;  %v1443_v3 = vld [vmem:[%s1858_s3 + $0x20] sm:$0xff] }
  0x13   :  { %248 = vmatpush.bf16.msra.mxu2 %v1434_v49  ;;  %361 = vmatpush.bf16.msra.mxu3 %v1452_v59  ;;  %v1460_v1 = vld [vmem:[%s1858_s3 + $0xa8] sm:$0xff]  ;;  %v1459_v4 = vld [vmem:[%s1858_s3 + $0xa0] sm:$0xff]  ;;  %v1450_v6 = vld [vmem:[%s1858_s3 + $0x58] sm:$0xff] }
  0x14   :  { %v1468_v2 = vld [vmem:[%s1858_s3 + $0xe8] sm:$0xff]  ;;  %v1467_v5 = vld [vmem:[%s1858_s3 + $0xe0] sm:$0xff]  ;;  %v1442_v7 = vld [vmem:[%s1858_s3 + $0x18] sm:$0xff] }
  0x15   :  { %994 = vmatmul.msk.bf16.vlgmr.msra.gmra.mxu0 %vm111_vm6, %v80_v57  ;;  %1019 = vmatmul.msk.bf16.vlgmr.msra.gmra.mxu1 %vm111_vm6, %v998_v56  ;;  %v1458_v8 = vld [vmem:[%s1858_s3 + $0x98] sm:$0xff]  ;;  %v1449_v10 = vld [vmem:[%s1858_s3 + $0x50] sm:$0xff]  ;;  %v1448_v14 = vld [vmem:[%s1858_s3 + $0x48] sm:$0xff] }
  0x16   :  { %424 = vmatpush.bf16.msrb.mxu0 %v1446_v52  ;;  %507 = vmatpush.bf16.msrb.mxu1 %v1462_v54  ;;  %v1466_v9 = vld [vmem:[%s1858_s3 + $0xd8] sm:$0xff]  ;;  %v1441_v11 = vld [vmem:[%s1858_s3 + $0x10] sm:$0xff]  ;;  %v1440_v15 = vld [vmem:[%s1858_s3 + $0x8] sm:$0xff] }
  0x17   :  { %591 = vmatpush.bf16.msrb.mxu2 %v1470_v55  ;;  %362 = vmatpush.bf16.msra.mxu3 %v1451_v63  ;;  %v1457_v12 = vld [vmem:[%s1858_s3 + $0x90] sm:$0xff]  ;;  %v1456_v16 = vld [vmem:[%s1858_s3 + $0x88] sm:$0xff]  ;;  %v1447_v18 = vld [vmem:[%s1858_s3 + $0x40] sm:$0xff] }
  0x18   :  { %1052 = vmatmul.msk.bf16.vlgmr.msra.gmra.mxu2 %vm111_vm6, %v207_v58  ;;  %v1465_v13 = vld [vmem:[%s1858_s3 + $0xd0] sm:$0xff]  ;;  %v1464_v17 = vld [vmem:[%s1858_s3 + $0xc8] sm:$0xff]  ;;  %v1478_v19 = vld [vmem:[%s1858_s3 + $0x138] sm:$0xff] }
  0x19   :  { %v1439_v20 = vld [vmem:[%s1858_s3] sm:$0xff]  ;;  %v1486_v23 = vld [vmem:[%s1858_s3 + $0x178] sm:$0xff]  ;;  %v1477_v26 = vld [vmem:[%s1858_s3 + $0x130] sm:$0xff] }
  0x1a   :  { %425 = vmatpush.bf16.msrb.mxu0 %v1445_v60  ;;  %508 = vmatpush.bf16.msrb.mxu1 %v1461_v61  ;;  %v1455_v21 = vld [vmem:[%s1858_s3 + $0x80] sm:$0xff]  ;;  %v1494_v24 = vld [vmem:[%s1858_s3 + $0x1b8] sm:$0xff]  ;;  %v1485_v27 = vld [vmem:[%s1858_s3 + $0x170] sm:$0xff] }
  0x1b   :  { %592 = vmatpush.bf16.msrb.mxu2 %v1469_v62  ;;  %363 = vmatpush.bf16.msra.mxu3 %v1450_v6  ;;  %v1463_v22 = vld [vmem:[%s1858_s3 + $0xc0] sm:$0xff]  ;;  %v1502_v25 = vld [vmem:[%s1858_s3 + $0x1f8] sm:$0xff]  ;;  %v1493_v28 = vld [vmem:[%s1858_s3 + $0x1b0] sm:$0xff] }
  0x1c   :  { %v1501_v29 = vld [vmem:[%s1858_s3 + $0x1f0] sm:$0xff]  ;;  %v1476_v30 = vld [vmem:[%s1858_s3 + $0x128] sm:$0xff]  ;;  %v1475_v34 = vld [vmem:[%s1858_s3 + $0x120] sm:$0xff] }
  0x1d   :  { %v1484_v31 = vld [vmem:[%s1858_s3 + $0x168] sm:$0xff]  ;;  %v1483_v35 = vld [vmem:[%s1858_s3 + $0x160] sm:$0xff]  ;;  %v1474_v38 = vld [vmem:[%s1858_s3 + $0x118] sm:$0xff] }
  0x1e   :  { %426 = vmatpush.bf16.msrb.mxu0 %v1444_v0  ;;  %509 = vmatpush.bf16.msrb.mxu1 %v1460_v1  ;;  %v1492_v32 = vld [vmem:[%s1858_s3 + $0x1a8] sm:$0xff]  ;;  %v1491_v36 = vld [vmem:[%s1858_s3 + $0x1a0] sm:$0xff]  ;;  %v1482_v39 = vld [vmem:[%s1858_s3 + $0x158] sm:$0xff] }
  0x1f   :  { %593 = vmatpush.bf16.msrb.mxu2 %v1468_v2  ;;  %364 = vmatpush.bf16.msra.mxu3 %v1449_v10  ;;  %v1500_v33 = vld [vmem:[%s1858_s3 + $0x1e8] sm:$0xff]  ;;  %v1499_v37 = vld [vmem:[%s1858_s3 + $0x1e0] sm:$0xff]  ;;  %v1490_v40 = vld [vmem:[%s1858_s3 + $0x198] sm:$0xff] }
  0x20   :  { %v1498_v41 = vld [vmem:[%s1858_s3 + $0x1d8] sm:$0xff]  ;;  %v1473_v42 = vld [vmem:[%s1858_s3 + $0x110] sm:$0xff]  ;;  %v1472_v48 = vld [vmem:[%s1858_s3 + $0x108] sm:$0xff] }
  0x21   :  { %v1481_v45 = vld [vmem:[%s1858_s3 + $0x150] sm:$0xff]  ;;  %v1480_v50 = vld [vmem:[%s1858_s3 + $0x148] sm:$0xff]  ;;  %v1504_v52 = vld [vmem:[%s1857_s2] ss:$0 sm:$0xff] }
  0x22   :  { %427 = vmatpush.bf16.msrb.mxu0 %v1443_v3  ;;  %510 = vmatpush.bf16.msrb.mxu1 %v1459_v4  ;;  %v1489_v46 = vld [vmem:[%s1858_s3 + $0x190] sm:$0xff]  ;;  %v1488_v51 = vld [vmem:[%s1858_s3 + $0x188] sm:$0xff]  ;;  %v1471_v54 = vld [vmem:[%s1858_s3 + $0x100] sm:$0xff] }
  0x23   :  { %594 = vmatpush.bf16.msrb.mxu2 %v1467_v5  ;;  %365 = vmatpush.bf16.msra.mxu3 %v1448_v14  ;;  %v1497_v47 = vld [vmem:[%s1858_s3 + $0x1d0] sm:$0xff]  ;;  %v1496_v53 = vld [vmem:[%s1858_s3 + $0x1c8] sm:$0xff]  ;;  %v1479_v57 = vld [vmem:[%s1858_s3 + $0x140] sm:$0xff] }
  0x24   :  { %v1487_v58 = vld [vmem:[%s1858_s3 + $0x180] sm:$0xff] }
  0x25   :  { %v1495_v60 = vld [vmem:[%s1858_s3 + $0x1c0] sm:$0xff] }
  0x26   :  { %428 = vmatpush.bf16.msrb.mxu0 %v1442_v7  ;;  %511 = vmatpush.bf16.msrb.mxu1 %v1458_v8 }
  0x27   :  { %595 = vmatpush.bf16.msrb.mxu2 %v1466_v9  ;;  %366 = vmatpush.bf16.msra.mxu3 %v1447_v18 }
  0x2a   :  { %429 = vmatpush.bf16.msrb.mxu0 %v1441_v11  ;;  %512 = vmatpush.bf16.msrb.mxu1 %v1457_v12 }
  0x2b   :  { %596 = vmatpush.bf16.msrb.mxu2 %v1465_v13  ;;  %675 = vmatpush.bf16.msrb.mxu3 %v1478_v19 }
  0x2e   :  { %430 = vmatpush.bf16.msrb.mxu0 %v1440_v15  ;;  %513 = vmatpush.bf16.msrb.mxu1 %v1456_v16 }
  0x2f   :  { %597 = vmatpush.bf16.msrb.mxu2 %v1464_v17  ;;  %676 = vmatpush.bf16.msrb.mxu3 %v1477_v26 }
  0x32   :  { %431 = vmatpush.bf16.msrb.mxu0 %v1439_v20  ;;  %514 = vmatpush.bf16.msrb.mxu1 %v1455_v21 }
  0x33   :  { %598 = vmatpush.bf16.msrb.mxu2 %v1463_v22  ;;  %677 = vmatpush.bf16.msrb.mxu3 %v1476_v30 }
  0x36   :  { %759 = vmatpush.bf16.msra.mxu0 %v1486_v23  ;;  %843 = vmatpush.bf16.msra.mxu1 %v1494_v24 }
  0x37   :  { %927 = vmatpush.bf16.msra.mxu2 %v1502_v25  ;;  %678 = vmatpush.bf16.msrb.mxu3 %v1475_v34 }
  0x3a   :  { %760 = vmatpush.bf16.msra.mxu0 %v1485_v27  ;;  %844 = vmatpush.bf16.msra.mxu1 %v1493_v28 }
  0x3b   :  { %928 = vmatpush.bf16.msra.mxu2 %v1501_v29  ;;  %679 = vmatpush.bf16.msrb.mxu3 %v1474_v38 }
  0x3e   :  { %761 = vmatpush.bf16.msra.mxu0 %v1484_v31  ;;  %845 = vmatpush.bf16.msra.mxu1 %v1492_v32 }
  0x3f   :  { %929 = vmatpush.bf16.msra.mxu2 %v1500_v33  ;;  %680 = vmatpush.bf16.msrb.mxu3 %v1473_v42 }
  0x42   :  { %762 = vmatpush.bf16.msra.mxu0 %v1483_v35  ;;  %846 = vmatpush.bf16.msra.mxu1 %v1491_v36 }
  0x43   :  { %930 = vmatpush.bf16.msra.mxu2 %v1499_v37  ;;  %681 = vmatpush.bf16.msrb.mxu3 %v1472_v48 }
  0x46   :  { %763 = vmatpush.bf16.msra.mxu0 %v1482_v39  ;;  %847 = vmatpush.bf16.msra.mxu1 %v1490_v40 }
  0x47   :  { %931 = vmatpush.bf16.msra.mxu2 %v1498_v41  ;;  %682 = vmatpush.bf16.msrb.mxu3 %v1471_v54 }
  0x4a   :  { %764 = vmatpush.bf16.msra.mxu0 %v1481_v45  ;;  %848 = vmatpush.bf16.msra.mxu1 %v1489_v46 }
  0x4b   :  { %932 = vmatpush.bf16.msra.mxu2 %v1497_v47 }
  0x4e   :  { %765 = vmatpush.bf16.msra.mxu0 %v1480_v50  ;;  %849 = vmatpush.bf16.msra.mxu1 %v1488_v51 }
  0x4f   :  { %933 = vmatpush.bf16.msra.mxu2 %v1496_v53 }
  0x52   :  { %766 = vmatpush.bf16.msra.mxu0 %v1479_v57  ;;  %850 = vmatpush.bf16.msra.mxu1 %v1487_v58 }
  0x53   :  { %934 = vmatpush.bf16.msra.mxu2 %v1495_v60 }
  0x92   :  { %v124_v43 = vpop.f32.mrf.mxu0  ;;  %v176_v44 = vpop.f32.mrf.mxu1 }
  0x93   :  { %v177_v49 = vadd.f32 %v176_v44, %v124_v43 }
  0x9a   :  { %v126_v61 = vpop.f32.mrf.mxu0  ;;  %v178_v62 = vpop.f32.mrf.mxu1 }
  0x9b   :  { %v250_v55 = vpop.f32.mrf.mxu2  ;;  %v179_v0 = vadd.f32 %v178_v62, %v126_v61 }
  0x9c   :  { %v255_v56 = vadd.f32 %v250_v55, %v177_v49 }
  0x9e   :  { %v261_v59 = vadd.f32 %v1504_v52, %v255_v56 }
  0xa0   :  { %v263_v63 = vpack.c.bf16 %v261_v59, %v261_v59  ;;  %v1505_v59 = vld [vmem:[%s1859_s4] ss:$0 sm:$0xff] }
  0xa2   :  { %v300_v2 = vunpack.c.l.b16 %v263_v63 }
  0xa3   :  { %v252_v1 = vpop.f32.mrf.mxu2 }
  0xa4   :  { %v256_v3 = vadd.f32 %v252_v1, %v179_v0  ;;  %v1069_v5 = vunpack.i.l.s16 %v300_v2 }
  0xa6   :  { %v262_v4 = vadd.f32 %v1504_v52, %v256_v3  ;;  %v306_v9 = vrot.slane %v1069_v5, 1  ;;  %v454_v10 = vrot.slane %v1069_v5, 2  ;;  %v538_v11 = vrot.slane %v1069_v5, 3 }
  0xa7   :  { %v622_v24 = vrot.slane %v1069_v5, 4  ;;  %v706_v29 = vrot.slane %v1069_v5, 5  ;;  %v790_v30 = vrot.slane %v1069_v5, 6  ;;  %v874_v31 = vrot.slane %v1069_v5, 7 }
  0xa8   :  { %v264_v6 = vpack.c.bf16 %v262_v4, %v262_v4 }
  0xaa   :  { %v301_v7 = vunpack.c.l.b16 %v264_v6 }
  0xac   :  { %v1070_v8 = vunpack.i.l.s16 %v301_v7 }
  0xae   :  { %v308_v12 = vsel %vm307_vm7, %v1070_v8, %v306_v9  ;;  %v372_v13 = vrot.slane %v1070_v8, 7  ;;  %v455_v14 = vrot.slane %v1070_v8, 1  ;;  %v539_v15 = vrot.slane %v1070_v8, 2 }
  0xaf   :  { %v309_v16 = vpack.c.b16 %v308_v12, %v308_v12  ;;  %v623_v23 = vrot.slane %v1070_v8, 3  ;;  %v707_v25 = vrot.slane %v1070_v8, 4  ;;  %v791_v26 = vrot.slane %v1070_v8, 5 }
  0xb0   :  { %v373_v17 = vsel %vm307_vm7, %v372_v13, %v1069_v5  ;;  %v456_v18 = vsel %vm307_vm7, %v455_v14, %v454_v10  ;;  %v540_v19 = vsel %vm307_vm7, %v539_v15, %v538_v11  ;;  %v875_v27 = vrot.slane %v1070_v8, 6 }
  0xb1   :  { %367 = vmatmul.bf16.vlgmr.msra.gmra.mxu3 %v309_v16  ;;  %v374_v20 = vpack.c.b16 %v373_v17, %v373_v17  ;;  %v457_v21 = vpack.c.b16 %v456_v18, %v456_v18  ;;  %v541_v22 = vpack.c.b16 %v540_v19, %v540_v19  ;;  %v624_v28 = vsel %vm307_vm7, %v623_v23, %v622_v24 }
  0xb2   :  { %v708_v32 = vsel %vm307_vm7, %v707_v25, %v706_v29  ;;  %v792_v33 = vsel %vm307_vm7, %v791_v26, %v790_v30  ;;  %v625_v34 = vpack.c.b16 %v624_v28, %v624_v28  ;;  %v876_v35 = vsel %vm307_vm7, %v875_v27, %v874_v31 }
  0xb3   :  { %432 = vmatmul.bf16.vlgmr.msrb.gmra.mxu0 %v374_v20  ;;  %515 = vmatmul.bf16.vlgmr.msrb.gmra.mxu1 %v457_v21  ;;  %v709_v36 = vpack.c.b16 %v708_v32, %v708_v32  ;;  %v793_v37 = vpack.c.b16 %v792_v33, %v792_v33  ;;  %v877_v38 = vpack.c.b16 %v876_v35, %v876_v35 }
  0xb4   :  { %599 = vmatmul.bf16.vlgmr.msrb.gmra.mxu2 %v541_v22 }
  0xc1   :  { %683 = vmatmul.bf16.vlgmr.msrb.gmra.mxu3 %v625_v34 }
  0xc3   :  { %767 = vmatmul.bf16.vlgmr.msra.gmra.mxu0 %v709_v36  ;;  %851 = vmatmul.bf16.vlgmr.msra.gmra.mxu1 %v793_v37 }
  0xc4   :  { %935 = vmatmul.bf16.vlgmr.msra.gmra.mxu2 %v877_v38 }
 0x130   :  { %v433_v39 = vpop.f32.mrf.mxu0  ;;  %v516_v40 = vpop.f32.mrf.mxu1 }
 0x134   :  { %v368_v41 = vpop.f32.mrf.mxu3 }
 0x135   :  { %v434_v45 = vadd.f32 %v433_v39, %v368_v41 }
 0x137   :  { %v600_v42 = vpop.f32.mrf.mxu2  ;;  %v520_v47 = vadd.f32 %v516_v40, %v434_v45 }
 0x138   :  { %v435_v43 = vpop.f32.mrf.mxu0  ;;  %v518_v44 = vpop.f32.mrf.mxu1 }
 0x139   :  { %v604_v51 = vadd.f32 %v600_v42, %v520_v47 }
 0x13c   :  { %v370_v46 = vpop.f32.mrf.mxu3 }
 0x13f   :  { %v602_v48 = vpop.f32.mrf.mxu2 }
 0x140   :  { %v768_v49 = vpop.f32.mrf.mxu0  ;;  %v852_v50 = vpop.f32.mrf.mxu1 }
 0x144   :  { %v684_v52 = vpop.f32.mrf.mxu3 }
 0x145   :  { %v688_v53 = vadd.f32 %v684_v52, %v604_v51 }
 0x147   :  { %v772_v54 = vadd.f32 %v768_v49, %v688_v53  ;;  %v936_v55 = vpop.f32.mrf.mxu2 }
 0x148   :  { %v770_v56 = vpop.f32.mrf.mxu0  ;;  %v854_v57 = vpop.f32.mrf.mxu1 }
 0x149   :  { %v856_v58 = vadd.f32 %v852_v50, %v772_v54 }
 0x14b   :  { %v940_v60 = vadd.f32 %v936_v55, %v856_v58 }
 0x14c   :  { %v686_v61 = vpop.f32.mrf.mxu3 }
 0x14d   :  { %v945_v62 = vadd.f32 %v1505_v59, %v940_v60 }
 0x14f   :  { %v938_v63 = vpop.f32.mrf.mxu2  ;;  %947 = vst.msk [vmem:[#allocation2] sm:$0x3] %vm946_vm8, %v945_v62 }
 0x150   :  { %958 = dma.vmem_to_hbm [thread:$0]  %s954_s6, 32, %s956_s9, [#allocation3]  }
 0x151   :  { %1530 = dma.done.wait [#allocation3], 32  }
 0x152   :  { %1531 = vsyncadd [#allocation3], 4294967264 }
 0x153   :  { %963 = vsyncpa [#allocation3], 1 }

</bundles_post_ra>
